<compile_context>
chip_gen: v6e
topology: v6e:2x2x1
jax: 0.10.0
libtpu: 0.0.40
codegen_flags: <defaults>
</compile_context>

<pallas_src>
import functools

import jax
import jax.numpy as jnp
from jax.experimental import pallas as pl
from jax.experimental.pallas import tpu as pltpu


def _round_up(x, m):
    return (x + m - 1) // m * m


def _pick_divisor_tile(total, target, align=128):
    """Largest multiple of `align` that divides `total` (itself a multiple of
    align) and does not exceed `target`.  Returns `total` if total <= target."""
    if total <= target:
        return total
    best = align
    d = align
    while d <= target:
        if total % d == 0:
            best = d
        d += align
    return best


def _tpu_generation_config():
    """Per-generation tile targets, scoped-VMEM limit and TensorCore count."""
    try:
        kind = jax.devices()[0].device_kind.lower()
    except Exception:
        kind = ""
    if "v7" in kind:
        # v7x: 64 MiB VMEM per TC, 2 TCs per chip -> keep tiles conservative,
        # make sure the parallel axis can feed both cores.
        return dict(tm=512, tf=512, vmem_limit_bytes=48 * 1024 * 1024, num_cores=2)
    if "v5" in kind or "v6" in kind:
        # v5e / v6e: 128 MiB physical VMEM, 1 TC -> use the headroom for bigger
        # tiles (fewer steps, less weight re-streaming).
        return dict(tm=512, tf=1024, vmem_limit_bytes=100 * 1024 * 1024, num_cores=1)
    # Unknown / older generation: conservative defaults, compiler-default VMEM cap.
    return dict(tm=512, tf=512, vmem_limit_bytes=None, num_cores=1)


# ------------------------------- kernels ------------------------------------


def _gelu_new_f32(h):
    # gelu_new (tanh approx) with folded constants: 0.5*h*(1 + tanh(h*(C1 + C2*h*h)))
    c1 = 0.7978845608028654          # sqrt(2/pi)
    c2 = c1 * 0.044715
    return 0.5 * h * (1.0 + jnp.tanh(h * (c1 + c2 * (h * h))))


def _ffn_kernel(x_ref, w_in_ref, w_out_ref, o_ref, acc_ref):
    # x_ref:     (tm, E_pad)   native dtype (resident across the k axis)
    # w_in_ref:  (E_pad, tf)   native dtype  (W_in^T F-tile)
    # w_out_ref: (tf, O_pad)   native dtype  (W_out^T F-tile)
    # o_ref:     (tm, O_pad)
    # acc_ref:   (tm, O_pad)   f32 scratch accumulator (resident across k)
    k = pl.program_id(1)

    # linear_in on the MXU: native-dtype operands, f32 accumulation.
    h = jnp.dot(x_ref[...], w_in_ref[...], preferred_element_type=jnp.float32)
    g = _gelu_new_f32(h)

    # linear_out on the MXU: contribution of this F tile.
    contrib = jnp.dot(g.astype(w_out_ref.dtype), w_out_ref[...],
                      preferred_element_type=jnp.float32)

    @pl.when(k == 0)
    def _():
        acc_ref[...] = contrib          # init with first partial product

    @pl.when(k > 0)
    def _():
        acc_ref[...] += contrib

    @pl.when(k == pl.num_programs(1) - 1)
    def _():
        o_ref[...] = acc_ref[...].astype(o_ref.dtype)


def _ffn_kernel_single(x_ref, w_in_ref, w_out_ref, o_ref):
    # Single F tile: skip the f32 accumulator round-trip entirely.
    h = jnp.dot(x_ref[...], w_in_ref[...], preferred_element_type=jnp.float32)
    g = _gelu_new_f32(h)
    o_ref[...] = jnp.dot(g.astype(w_out_ref.dtype), w_out_ref[...],
                         preferred_element_type=jnp.float32).astype(o_ref.dtype)


# ------------------------------ host wrappers --------------------------------


def prepare_ffn_weights(linear_in_weight, linear_out_weight, dtype=None):
    """Transpose + lane-pad the FFN weights ONCE (model-load time, outside jit).

    linear_in_weight:  [ff_dim, embed_dim]   (PyTorch nn.Linear layout)
    linear_out_weight: [output_dim, ff_dim]

    Returns (w_in_p [E_pad, F_pad], w_out_p [F_pad, O_pad], output_dim).
    Zero padding is exact for this FFN: gelu_new(0) = 0 and the padded W_out
    rows are zero.
    """
    w_in = jnp.asarray(linear_in_weight)
    w_out = jnp.asarray(linear_out_weight)
    if dtype is not None:
        w_in = w_in.astype(dtype)
        w_out = w_out.astype(dtype)
    F, E = w_in.shape
    O, F2 = w_out.shape
    assert F == F2, "ff_dim mismatch between linear_in and linear_out"
    E_pad = _round_up(E, 128)
    F_pad = _round_up(F, 128)
    O_pad = _round_up(O, 128)
    w_in_p = jnp.pad(w_in.T, ((0, E_pad - E), (0, F_pad - F)))
    w_out_p = jnp.pad(w_out.T, ((0, F_pad - F), (0, O_pad - O)))
    return w_in_p, w_out_p, O


@functools.partial(
    jax.jit,
    static_argnames=("out_dim", "tm_target", "tf_target",
                     "vmem_limit_bytes", "num_cores"))
def _ffn_pallas_jit(hidden_states, w_in_p, w_out_p, *, out_dim, tm_target,
                    tf_target, vmem_limit_bytes, num_cores):
    B, S, E = hidden_states.shape
    E_pad, F_pad = w_in_p.shape
    F_pad2, O_pad = w_out_p.shape
    assert F_pad == F_pad2 and E <= E_pad and out_dim <= O_pad
    M = B * S
    dtype = hidden_states.dtype
    itemsize = jnp.dtype(dtype).itemsize
    w_itemsize = jnp.dtype(w_in_p.dtype).itemsize

    # Row alignment: native sublane tile is 8 rows at 32-bit, 16 at 16-bit.
    row_align = 8 * max(1, 4 // itemsize)

    # F tile: largest 128-multiple divisor of F_pad <= target -> zero dead F cols.
    tf = _pick_divisor_tile(F_pad, tf_target, 128)

    # M tile: as large as the per-generation target allows (fewer M tiles =>
    # proportionally less weight re-streaming from HBM).
    tm = _round_up(min(tm_target, _round_up(M, row_align)), row_align)
    M_pad = _round_up(M, tm)

    # v7x megacore: guarantee >= 2 blocks on the parallel axis when there is
    # enough work so both TensorCores get fed.
    if num_cores >= 2 and M_pad // tm < 2:
        half = _round_up((M_pad + 1) // 2, row_align)
        if half >= 128:
            tm = half
            M_pad = 2 * tm

    grid_m = M_pad // tm
    grid_k = F_pad // tf

    # Only the activations are padded per call (weights were padded at load).
    x2d = hidden_states.reshape(M, E)
    x_p = jnp.pad(x2d, ((0, M_pad - M), (0, E_pad - E)))

    # Scheduling hint with the *real* traffic: weights re-read once per M tile.
    cost = pl.CostEstimate(
        flops=2 * M_pad * F_pad * (E_pad + O_pad),
        transcendentals=M_pad * F_pad,
        bytes_accessed=(x_p.size * itemsize
                        + grid_m * (w_in_p.size + w_out_p.size) * w_itemsize
                        + M_pad * O_pad * itemsize),
    )

    if grid_k == 1:
        grid_spec = pltpu.PrefetchScalarGridSpec(
            num_scalar_prefetch=0,
            grid=(grid_m,),
            in_specs=[
                pl.BlockSpec((tm, E_pad), lambda i: (i, 0)),   # x tile
                pl.BlockSpec((E_pad, tf), lambda i: (0, 0)),   # full W_in^T
                pl.BlockSpec((tf, O_pad), lambda i: (0, 0)),   # full W_out^T
            ],
            out_specs=pl.BlockSpec((tm, O_pad), lambda i: (i, 0)),
        )
        kernel = _ffn_kernel_single
        dims = ("parallel",)
    else:
        grid_spec = pltpu.PrefetchScalarGridSpec(
            num_scalar_prefetch=0,
            grid=(grid_m, grid_k),
            in_specs=[
                pl.BlockSpec((tm, E_pad), lambda i, k: (i, 0)),   # x tile, resident across k
                pl.BlockSpec((E_pad, tf), lambda i, k: (0, k)),   # W_in^T F-tile
                pl.BlockSpec((tf, O_pad), lambda i, k: (k, 0)),   # W_out^T F-tile
            ],
            out_specs=pl.BlockSpec((tm, O_pad), lambda i, k: (i, 0)),
            scratch_shapes=[pltpu.VMEM((tm, O_pad), jnp.float32)],
        )
        kernel = _ffn_kernel
        dims = ("parallel", "arbitrary")

    out2d = pl.pallas_call(
        kernel,
        out_shape=jax.ShapeDtypeStruct((M_pad, O_pad), dtype),
        grid_spec=grid_spec,
        compiler_params=pltpu.CompilerParams(
            dimension_semantics=dims,
            vmem_limit_bytes=vmem_limit_bytes,
        ),
        cost_estimate=cost,
    )(x_p, w_in_p, w_out_p)

    return out2d[:M, :out_dim].reshape(B, S, out_dim)


def ffn_pallas(hidden_states, w_in_p, w_out_p, out_dim, *, tm=None, tf=None):
    """hidden_states: [B, S, E]; w_in_p / w_out_p: outputs of prepare_ffn_weights."""
    cfg = _tpu_generation_config()
    return _ffn_pallas_jit(
        hidden_states, w_in_p, w_out_p,
        out_dim=int(out_dim),
        tm_target=int(tm if tm is not None else cfg["tm"]),
        tf_target=int(tf if tf is not None else cfg["tf"]),
        vmem_limit_bytes=cfg["vmem_limit_bytes"],
        num_cores=cfg["num_cores"],
    )


def ffn_reference(hidden_states, w_in_t, w_out_t):
    """Pure-JAX reference (same math as PyTorch gelu_new), computed in f32."""
    h = jnp.einsum("bse,ef->bsf", hidden_states.astype(jnp.float32),
                   w_in_t.astype(jnp.float32))
    c = 0.7978845608028654
    g = 0.5 * h * (1.0 + jnp.tanh(c * (h + 0.044715 * h**3)))
    y = jnp.einsum("bsf,fo->bso", g, w_out_t.astype(jnp.float32))
    return y


if __name__ == "__main__":
    # Small shapes consistent with the module's forward.
    B, S = 2, 8
    embed_dim, ff_dim, output_dim = 32, 64, 32

    key = jax.random.PRNGKey(0)
    kx, kin, kout = jax.random.split(key, 3)

    # PyTorch parameter layouts: linear_in.weight [ff_dim, embed_dim],
    # linear_out.weight [output_dim, ff_dim].
    w_in = jax.random.normal(kin, (ff_dim, embed_dim), jnp.float32) * 0.02
    w_out = jax.random.normal(kout, (output_dim, ff_dim), jnp.float32) * 0.02
    x = jax.random.normal(kx, (B, S, embed_dim), jnp.float32)

    # bf16 activations / weights: the fast MXU path the kernel targets.
    x_bf16 = x.astype(jnp.bfloat16)

    # Weights transposed + padded ONCE (model-load time), not per call.
    w_in_p, w_out_p, out_dim = prepare_ffn_weights(w_in, w_out, dtype=jnp.bfloat16)

    out = ffn_pallas(x_bf16, w_in_p, w_out_p, out_dim)
    out = jax.block_until_ready(out)
    assert out.shape == (B, S, output_dim)
    assert out.dtype == jnp.bfloat16

    ref = ffn_reference(x_bf16, w_in.T.astype(jnp.bfloat16),
                        w_out.T.astype(jnp.bfloat16))
    assert jnp.allclose(out.astype(jnp.float32), ref, atol=1e-3, rtol=5e-2), \
        "mismatch vs reference"

    print("KERNEL_OK")
</pallas_src>

<mosaic_0001>
module attributes {stable_mosaic.version = 11 : i64} {
  func.func @_ffn_kernel_single(%arg0: i32, %arg1: memref<16x128xbf16, #tpu.memory_space<vmem>>, %arg2: memref<128x128xbf16, #tpu.memory_space<vmem>>, %arg3: memref<128x128xbf16, #tpu.memory_space<vmem>>, %arg4: memref<16x128xbf16, #tpu.memory_space<vmem>>) attributes {dimension_semantics = [#tpu.dimension_semantics<parallel>], iteration_bounds = array<i64: 1>, scalar_prefetch = 0 : i64, scratch_operands = 0 : i64, tpu.core_type = #tpu.core_type<tc>, window_params = [{transform_indices = @transform_0, window_bounds = array<i64: 16, 128>}, {pipeline_mode = #tpu.pipeline_mode<synchronous>, transform_indices = @transform_1, window_bounds = array<i64: 128, 128>}, {pipeline_mode = #tpu.pipeline_mode<synchronous>, transform_indices = @transform_2, window_bounds = array<i64: 128, 128>}, {transform_indices = @transform_3, window_bounds = array<i64: 16, 128>}]} {
    %c0 = arith.constant 0 : index
    %c0_0 = arith.constant 0 : index
    %0 = vector.load %arg1[%c0, %c0_0] : memref<16x128xbf16, #tpu.memory_space<vmem>>, vector<16x128xbf16>
    %c0_1 = arith.constant 0 : index
    %c0_2 = arith.constant 0 : index
    %1 = vector.load %arg2[%c0_1, %c0_2] : memref<128x128xbf16, #tpu.memory_space<vmem>>, vector<128x128xbf16>
    %cst = arith.constant dense<0.000000e+00> : vector<16x128xf32>
    %2 = tpu.matmul %0, %1, %cst {dimension_numbers = #tpu.dot_dimension_numbers<[1], [0], [0], [1], [0, 0, 1, 1], [], []>} : vector<16x128xbf16>, vector<128x128xbf16>, vector<16x128xf32> -> vector<16x128xf32>
    %cst_3 = arith.constant 5.000000e-01 : f32
    %3 = vector.broadcast %cst_3 : f32 to vector<16x128xf32>
    %4 = arith.mulf %3, %2 : vector<16x128xf32>
    %5 = arith.mulf %2, %2 : vector<16x128xf32>
    %cst_4 = arith.constant 0.0356774069 : f32
    %6 = vector.broadcast %cst_4 : f32 to vector<16x128xf32>
    %7 = arith.mulf %6, %5 : vector<16x128xf32>
    %cst_5 = arith.constant 0.797884583 : f32
    %8 = vector.broadcast %cst_5 : f32 to vector<16x128xf32>
    %9 = arith.addf %8, %7 : vector<16x128xf32>
    %10 = arith.mulf %2, %9 : vector<16x128xf32>
    %11 = math.tanh %10 : vector<16x128xf32>
    %cst_6 = arith.constant 1.000000e+00 : f32
    %12 = vector.broadcast %cst_6 : f32 to vector<16x128xf32>
    %13 = arith.addf %12, %11 : vector<16x128xf32>
    %14 = arith.mulf %4, %13 : vector<16x128xf32>
    %15 = arith.truncf %14 : vector<16x128xf32> to vector<16x128xbf16>
    %c0_7 = arith.constant 0 : index
    %c0_8 = arith.constant 0 : index
    %16 = vector.load %arg3[%c0_7, %c0_8] : memref<128x128xbf16, #tpu.memory_space<vmem>>, vector<128x128xbf16>
    %cst_9 = arith.constant dense<0.000000e+00> : vector<16x128xf32>
    %17 = tpu.matmul %15, %16, %cst_9 {dimension_numbers = #tpu.dot_dimension_numbers<[1], [0], [0], [1], [0, 0, 1, 1], [], []>} : vector<16x128xbf16>, vector<128x128xbf16>, vector<16x128xf32> -> vector<16x128xf32>
    %18 = arith.truncf %17 : vector<16x128xf32> to vector<16x128xbf16>
    %c0_10 = arith.constant 0 : index
    %c0_11 = arith.constant 0 : index
    %19 = vector.load %arg4[%c0_10, %c0_11] : memref<16x128xbf16, #tpu.memory_space<vmem>>, vector<16x128xbf16>
    tpu.vector_store %arg4[%c0_10, %c0_11], %18 {strides = array<i32>} : memref<16x128xbf16, #tpu.memory_space<vmem>>, vector<16x128xbf16>,
    return
  }
  func.func @transform_0(%arg0: i32) -> (i32, i32) {
    %c0_i32 = arith.constant 0 : i32
    %c0_i32_0 = arith.constant 0 : i32
    return %arg0, %c0_i32 : i32, i32
  }
  func.func @transform_1(%arg0: i32) -> (i32, i32) {
    %c0_i32 = arith.constant 0 : i32
    %c0_i32_0 = arith.constant 0 : i32
    %c0_i32_1 = arith.constant 0 : i32
    return %c0_i32, %c0_i32_0 : i32, i32
  }
  func.func @transform_2(%arg0: i32) -> (i32, i32) {
    %c0_i32 = arith.constant 0 : i32
    %c0_i32_0 = arith.constant 0 : i32
    %c0_i32_1 = arith.constant 0 : i32
    return %c0_i32, %c0_i32_0 : i32, i32
  }
  func.func @transform_3(%arg0: i32) -> (i32, i32) {
    %c0_i32 = arith.constant 0 : i32
    %c0_i32_0 = arith.constant 0 : i32
    return %arg0, %c0_i32 : i32, i32
  }
}

</mosaic_0001>

<bundles_post_ra>
// kernel: _ffn_pallas_jit.1
= control target key start
LH: loop header
LB: loop body
LE: loop exit
PB: predicated region body
PF: predicated region fallthrough
CT: control target
= control target key end

     0   :  { %8 = vsyncpa [#allocation3], 0  ;;  %s487_s0 = inlined_call_operand.vmem [shape: bf16[16,128], index: 0, kind: input, shape index: {}]   ;;  %s488_s1 = inlined_call_operand.hbm [shape: bf16[128,128], index: 1, kind: input, shape index: {}]   ;;  %s489_s2 = inlined_call_operand.hbm [shape: bf16[128,128], index: 2, kind: input, shape index: {}]   ;;  %s490_s3 = inlined_call_operand.vmem [shape: bf16[16,128], index: 3, kind: output, shape index: {}]  }
   0x1   :  { %9 = vsyncpa [#allocation5], 0  ;;  %s449_s12 = smov [#allocation2]  }
   0x2   :  { %s17_s13 = sshll.u32 %s449_s12, 4  ;;  %s18_s13 = int_to_ptr.vmem [resolvable:$true] %s17_s13 }
   0x3   :  { %s413_s14 = scalar_lea.vmem %s18_s13, 1024  ;;  %p418_p1 = scmp.lt.s32.totalorder %s18_s13, %s18_s13 }
   0x4   :  { %p414_p0 = scmp.ne.s32.totalorder %s18_s13, %s413_s14  ;;  %p419_p2 = scmp.lt.s32.totalorder %s413_s14, %s413_s14 }
   0x6   :  { %p420_p3 = por %p419_p2, %p418_p1 }
   0x8   :  { %p421_p4 = pnand %p420_p3, %p414_p0 }
   0xa   :  { %424 = shalt.err (!%p421_p4)
}
   0xb   :  { %s450_s15 = smov 64   ;;  %s451_s16 = smov 4  }
   0xc   :  { %23 = dma.hbm_to_vmem [thread:$0]  %s488_s1, 1024, %s18_s13, [#allocation3], %s450_s15, %s450_s15, %s451_s16  }
   0xd   :  { %s452_s19 = smov [#allocation4]  }
   0xe   :  { %s29_s20 = sshll.u32 %s452_s19, 4  ;;  %s30_s20 = int_to_ptr.vmem [resolvable:$true] %s29_s20 }
   0xf   :  { %s433_s21 = scalar_lea.vmem %s30_s20, 1024  ;;  %p438_p6 = scmp.lt.s32.totalorder %s30_s20, %s30_s20 }
  0x10   :  { %p434_p5 = scmp.ne.s32.totalorder %s30_s20, %s433_s21  ;;  %p439_p7 = scmp.lt.s32.totalorder %s433_s21, %s433_s21 }
  0x12   :  { %p440_p8 = por %p439_p7, %p438_p6 }
  0x14   :  { %p441_p9 = pnand %p440_p8, %p434_p5 }
  0x16   :  { %444 = shalt.err (!%p441_p9)
}
  0x17   :  { %35 = dma.hbm_to_vmem [thread:$0]  %s489_s2, 1024, %s30_s20, [#allocation5], %s450_s15, %s450_s15, %s451_s16  }
  0x18   :  { %445 = dma.done.wait [#allocation3], 1024  }
  0x19   :  { %446 = vsyncadd [#allocation3], 4294966272 }
  0x1a   :  { %447 = dma.done.wait [#allocation5], 1024  }
  0x1b   :  { %448 = vsyncadd [#allocation5], 4294966272  ;;  %v453_v0 = vmov 0.0   ;;  %vm454_vm0 = vmmov 0   ;;  %v384_v1 = vld [vmem:[#allocation2 + $0x38] sm:$0xff]   ;;  %v385_v2 = vld [vmem:[#allocation2 + $0x30] sm:$0xff]  }
  0x1c   :  { %338 = vmatprep.subr.bf16.mxu0 %v453_v0  ;;  %354 = vmatprep.mubr.msk.bf16.mxu0 %vm454_vm0, %v453_v0  ;;  %v386_v3 = vld [vmem:[#allocation2 + $0x28] sm:$0xff]   ;;  %v387_v4 = vld [vmem:[#allocation2 + $0x20] sm:$0xff]   ;;  %v388_v5 = vld [vmem:[#allocation2 + $0x18] sm:$0xff]  }
  0x1d   :  { %358 = vmatprep.subr.bf16.mxu1 %v453_v0  ;;  %374 = vmatprep.mubr.msk.bf16.mxu1 %vm454_vm0, %v453_v0  ;;  %v389_v6 = vld [vmem:[#allocation2 + $0x10] sm:$0xff]   ;;  %v390_v7 = vld [vmem:[#allocation2 + $0x8] sm:$0xff]   ;;  %v391_v8 = vld [vmem:[#allocation2] sm:$0xff]  }
  0x1e   :  { %339 = vmatpush3.bf16.msra.mxu0 %v384_v1  ;;  %v392_v9 = vld [vmem:[%s487_s0] sm:$0xff]   ;;  %v393_v10 = vld [vmem:[#allocation4 + $0x38] sm:$0xff]   ;;  %v394_v11 = vld [vmem:[#allocation4 + $0x30] sm:$0xff]  }
  0x1f   :  { %340 = vmatprep.subr.bf16.mxu0 %v453_v0  ;;  %359 = vmatpush3.bf16.msra.mxu1 %v393_v10  ;;  %v395_v12 = vld [vmem:[#allocation4 + $0x28] sm:$0xff]   ;;  %v396_v13 = vld [vmem:[#allocation4 + $0x20] sm:$0xff]   ;;  %v397_v14 = vld [vmem:[#allocation4 + $0x18] sm:$0xff]  }
  0x20   :  { %360 = vmatprep.subr.bf16.mxu1 %v453_v0  ;;  %v398_v15 = vld [vmem:[#allocation4 + $0x10] sm:$0xff]   ;;  %v399_v16 = vld [vmem:[#allocation4 + $0x8] sm:$0xff]   ;;  %v400_v17 = vld [vmem:[#allocation4] sm:$0xff]  }
  0x22   :  { %341 = vmatpush3.bf16.msra.mxu0 %v385_v2 }
  0x23   :  { %342 = vmatprep.subr.bf16.mxu0 %v453_v0  ;;  %361 = vmatpush3.bf16.msra.mxu1 %v394_v11 }
  0x24   :  { %362 = vmatprep.subr.bf16.mxu1 %v453_v0 }
  0x26   :  { %343 = vmatpush3.bf16.msra.mxu0 %v386_v3 }
  0x27   :  { %344 = vmatprep.subr.bf16.mxu0 %v453_v0  ;;  %363 = vmatpush3.bf16.msra.mxu1 %v395_v12 }
  0x28   :  { %364 = vmatprep.subr.bf16.mxu1 %v453_v0 }
  0x2a   :  { %345 = vmatpush3.bf16.msra.mxu0 %v387_v4 }
  0x2b   :  { %346 = vmatprep.subr.bf16.mxu0 %v453_v0  ;;  %365 = vmatpush3.bf16.msra.mxu1 %v396_v13 }
  0x2c   :  { %366 = vmatprep.subr.bf16.mxu1 %v453_v0 }
  0x2e   :  { %347 = vmatpush3.bf16.msra.mxu0 %v388_v5 }
  0x2f   :  { %348 = vmatprep.subr.bf16.mxu0 %v453_v0  ;;  %367 = vmatpush3.bf16.msra.mxu1 %v397_v14 }
  0x30   :  { %368 = vmatprep.subr.bf16.mxu1 %v453_v0 }
  0x32   :  { %349 = vmatpush3.bf16.msra.mxu0 %v389_v6 }
  0x33   :  { %350 = vmatprep.subr.bf16.mxu0 %v453_v0  ;;  %369 = vmatpush3.bf16.msra.mxu1 %v398_v15 }
  0x34   :  { %370 = vmatprep.subr.bf16.mxu1 %v453_v0 }
  0x36   :  { %351 = vmatpush3.bf16.msra.mxu0 %v390_v7 }
  0x37   :  { %352 = vmatprep.subr.bf16.mxu0 %v453_v0  ;;  %371 = vmatpush3.bf16.msra.mxu1 %v399_v16 }
  0x38   :  { %372 = vmatprep.subr.bf16.mxu1 %v453_v0 }
  0x3a   :  { %353 = vmatpush3.bf16.msra.mxu0 %v391_v8 }
  0x3b   :  { %373 = vmatpush3.bf16.msra.mxu1 %v400_v17 }
  0x3d   :  { %355 = vmatmul.mubr.bf16.vlgmr.msra.gmra.mxu0 %v392_v9 }
  0xfd   :  { %v149_v18 = vpop.f32.mrf.mxu0 }
  0xfe   :  { %v158_v19 = vmul.f32 %v149_v18, %v149_v18  ;;  %v156_v33 = vmul.f32 0.5, %v149_v18 }
  0xff   :  { %v356_v20 = vpop.f32.mrf.mxu0 }
 0x100   :  { %v160_v21 = vmul.f32 0.035677407, %v158_v19 }
 0x101   :  { %v152_v22 = vpop.f32.mrf.mxu0 }
 0x102   :  { %v162_v23 = vadd.f32 0.7978846, %v160_v21  ;;  %v159_v24 = vmul.f32 %v152_v22, %v152_v22  ;;  %v157_v34 = vmul.f32 0.5, %v152_v22 }
 0x103   :  { %v357_v25 = vpop.f32.mrf.mxu0 }
 0x104   :  { %v164_v26 = vmul.f32 %v162_v23, %v149_v18  ;;  %v161_v27 = vmul.f32 0.035677407, %v159_v24 }
 0x106   :  { %401 = vtanh.f32 %v164_v26  ;;  %v163_v28 = vadd.f32 0.7978846, %v161_v27 }
 0x108   :  { %v165_v29 = vmul.f32 %v163_v28, %v152_v22 }
 0x10a   :  { %403 = vtanh.f32 %v165_v29 }
 0x113   :  { %v402_v30 = vpop.eup %401 }
 0x114   :  { %v168_v31 = vadd.f32 1.0, %v402_v30 }
 0x116   :  { %v170_v36 = vmul.f32 %v168_v31, %v156_v33 }
 0x117   :  { %v404_v32 = vpop.eup %403 }
 0x118   :  { %v169_v35 = vadd.f32 1.0, %v404_v32 }
 0x11a   :  { %v171_v37 = vmul.f32 %v169_v35, %v157_v34 }
 0x11c   :  { %v172_v38 = vpack.c.bf16 %v171_v37, %v170_v36 }
 0x11e   :  { %375 = vmatmul.mubr.bf16.vlgmr.msra.gmra.mxu1 %v172_v38 }
 0x1de   :  { %v271_v39 = vpop.f32.mrf.mxu1 }
 0x1e0   :  { %v376_v40 = vpop.f32.mrf.mxu1 }
 0x1e2   :  { %v274_v41 = vpop.f32.mrf.mxu1 }
 0x1e3   :  { %v318_v42 = vpack.c.bf16 %v274_v41, %v271_v39 }
 0x1e4   :  { %v377_v43 = vpop.f32.mrf.mxu1 }
 0x1e5   :  { %319 = vst [vmem:[%s490_s3] sm:$0xff] %v318_v42  }
 0x1e6   :  { %292 = vsyncpa [#allocation3], 1 }
 0x1e7   :  { %293 = vsyncpa [#allocation5], 1 }

</bundles_post_ra>
